<compile_context>
chip_gen: v7x
topology: tpu7x:2x2x1
jax: 0.10.0
libtpu: 0.0.40
codegen_flags: <defaults>
</compile_context>

<pallas_src>
import functools

import jax
import jax.numpy as jnp
from jax.experimental import pallas as pl
from jax.experimental.pallas import tpu as pltpu

_MIB = 1 << 20


# --------------------------------------------------------------------------
# Kernels
# --------------------------------------------------------------------------
def _film_ln_epilogue(a, gamma1, beta, lnw, lnb, eps):
    # a + (a * gamma + beta) == a * (gamma + 1) + beta; the "+1" is already
    # folded into the gamma bias by the wrapper, so gamma1 == gamma + 1.
    x = a * gamma1 + beta
    # Two-pass (centered) variance: matches torch LayerNorm and avoids
    # cancellation at large activations.  Biased variance, eps inside sqrt.
    mean = jnp.mean(x, axis=-1, keepdims=True)
    centered = x - mean
    var = jnp.mean(centered * centered, axis=-1, keepdims=True)
    inv = jax.lax.rsqrt(var + eps)
    return centered * inv * lnw + lnb


def film_kernel(a_ref, b_ref, wg_ref, wb_ref, bg1_ref, bb_ref, lnw_ref, lnb_ref,
                o_ref, *, eps):
    # a_ref / b_ref / o_ref: (tm, D).  wg_ref / wb_ref: (D, D).  others: (1, D).
    b = b_ref[...]                                        # native dtype -> MXU
    gamma1 = jnp.dot(b, wg_ref[...], preferred_element_type=jnp.float32)
    beta = jnp.dot(b, wb_ref[...], preferred_element_type=jnp.float32)
    gamma1 = gamma1 + bg1_ref[...].astype(jnp.float32)    # bias already has +1
    beta = beta + bb_ref[...].astype(jnp.float32)
    y = _film_ln_epilogue(a_ref[...].astype(jnp.float32), gamma1, beta,
                          lnw_ref[...].astype(jnp.float32),
                          lnb_ref[...].astype(jnp.float32), eps)
    o_ref[...] = y.astype(o_ref.dtype)


def film_kernel_ksplit(a_ref, b_ref, wg_ref, wb_ref, bg1_ref, bb_ref, lnw_ref,
                       lnb_ref, o_ref, accg_ref, accb_ref, *, eps):
    # K-tiled variant for large D: b_ref is (tm, dk), weight slabs are (dk, D),
    # gamma/beta accumulate in f32 VMEM scratch; epilogue runs on the last k.
    k = pl.program_id(1)

    @pl.when(k == 0)
    def _():
        accg_ref[...] = jnp.zeros_like(accg_ref)
        accb_ref[...] = jnp.zeros_like(accb_ref)

    b = b_ref[...]
    accg_ref[...] += jnp.dot(b, wg_ref[...], preferred_element_type=jnp.float32)
    accb_ref[...] += jnp.dot(b, wb_ref[...], preferred_element_type=jnp.float32)

    @pl.when(k == pl.num_programs(1) - 1)
    def _():
        gamma1 = accg_ref[...] + bg1_ref[...].astype(jnp.float32)
        beta = accb_ref[...] + bb_ref[...].astype(jnp.float32)
        y = _film_ln_epilogue(a_ref[...].astype(jnp.float32), gamma1, beta,
                              lnw_ref[...].astype(jnp.float32),
                              lnb_ref[...].astype(jnp.float32), eps)
        o_ref[...] = y.astype(o_ref.dtype)


# --------------------------------------------------------------------------
# Sizing helpers (generation-aware)
# --------------------------------------------------------------------------
def _sublane(dtype):
    return {4: 8, 2: 16, 1: 32}.get(jnp.dtype(dtype).itemsize, 8)


def _vmem_capacity_bytes():
    # Per-core VMEM: 128 MiB on v5e/v6e, 64 MiB on v7x.  Fall back to the
    # smallest (v7x) when the query is unavailable.
    try:
        cap = getattr(pltpu.get_tpu_info(), "vmem_capacity_bytes", None)
        if cap:
            return int(cap)
    except Exception:
        pass
    return 64 * _MIB


def _pick_row_tile(n, d, dtype, avail_bytes, extra_f32_rows=8, max_tile=2048):
    """Largest row tile fitting `avail_bytes` (VMEM left after the resident
    weight/param blocks), preferring an even number (>= 4) of grid steps so
    dimension_semantics=("parallel",) balances v7x's two TensorCores."""
    itemsize = jnp.dtype(dtype).itemsize
    sub = _sublane(dtype)
    # double-buffered a / b / out row tiles + f32 in-kernel temporaries
    per_row = 2 * 3 * d * itemsize + extra_f32_rows * max(d, 128) * 4
    cap = int(max(sub, min(max_tile, avail_bytes // per_row)))
    if n <= 128 or cap < 128:
        if cap >= n:
            return n                                  # one full-height block
        return max(sub, (min(cap, n) // sub) * sub)
    cap = min((cap // 128) * 128, ((n + 127) // 128) * 128)
    best_key, best_tm = None, 128
    tm = cap
    while tm >= 128:
        steps = pl.cdiv(n, tm)
        key = (steps >= 4 and steps % 2 == 0,   # balanced across 2 TCs (v7x)
               steps >= 2,                      # both TCs busy at all
               tm)                              # then the biggest tile
        if best_key is None or key > best_key:
            best_key, best_tm = key, tm
        tm -= 128
    return best_tm


def _vmem_limit_bytes(tm, d, dk, in_item, w_item, w_bufs, nk, usable):
    rows = 2 * tm * (2 * d + dk) * in_item        # double-buffered a / b / out
    weights = w_bufs * 2 * dk * d * w_item        # gamma + beta slabs
    params = 2 * 4 * 8 * max(d, 128) * 4          # bias / LN rows (padded)
    scratch = 2 * tm * d * 4 if nk > 1 else 0     # f32 accumulators
    temps = 8 * tm * max(d, 128) * 4              # f32 epilogue temporaries
    est = rows + weights + params + scratch + temps + 4 * _MIB
    # Never request more than ~80% of physical VMEM (leaves compiler scratch
    # headroom on v7x's 64 MiB); never shrink below the 32 MiB default.
    return int(max(32 * _MIB, min(usable, est)))


# --------------------------------------------------------------------------
# Wrapper
# --------------------------------------------------------------------------
def film_layer(a_feat, b_feat, w, w_bias, ln_w, ln_b, *, eps=1e-5,
               row_tile=None, k_tile=None):
    """a_feat, b_feat: (..., D).  w: (D, 2D) = transpose of torch's (2D, D)
    Linear weight (gamma half first).  w_bias: (2D,).  ln_w, ln_b: (D,)."""
    assert a_feat.shape == b_feat.shape
    d = a_feat.shape[-1]
    assert w.shape == (d, 2 * d) and w_bias.shape == (2 * d,)
    orig_shape = a_feat.shape
    # NOTE: D is the lane axis.  D >= 128 (a multiple of 128) keeps loads and
    # stores lane-dense; smaller D still runs (block == full dim) but pays
    # masked partial stores -- acceptable for toy / test configs only.

    a2 = a_feat.reshape(-1, d)
    b2 = b_feat.reshape(-1, d)
    n = a2.shape[0]

    in_item = jnp.dtype(a_feat.dtype).itemsize
    w_item = jnp.dtype(w.dtype).itemsize
    usable = int(_vmem_capacity_bytes() * 0.8)   # leave compiler-scratch headroom

    # ---- contraction (K) tiling: keep resident weights <= ~1/3 of usable VMEM.
    single_buf = d >= 512        # single-buffering only pays off for big blocks
    dk = d
    if k_tile is not None:
        assert d % k_tile == 0 and (k_tile == d or k_tile % 128 == 0)
        dk = k_tile
    elif (1 if single_buf else 2) * 2 * d * d * w_item > usable // 3:
        while (2 * 2 * dk * d * w_item > usable // 3
               and dk % 2 == 0 and (dk // 2) % 128 == 0):
            dk //= 2
    nk = d // dk
    if nk > 1:
        single_buf = False       # K-streamed weight slabs want double buffering
    w_bufs = 1 if single_buf else 2

    # ---- row tile, sized from what's left after the resident blocks.
    resident = w_bufs * 2 * dk * d * w_item + 2 * 4 * 8 * max(d, 128) * 4
    avail = max(usable - resident, 2 * _MIB)
    tm = row_tile if row_tile is not None else _pick_row_tile(
        n, d, a_feat.dtype, avail, extra_f32_rows=10 if nk > 1 else 8)
    grid_rows = pl.cdiv(n, tm)   # ragged last block: rows past n are read as
                                 # garbage but never written back (row-wise op)

    # ---- params: fold the FiLM "+1" into the gamma bias (in f32, lossless).
    bg1 = (w_bias[:d].astype(jnp.float32) + 1.0).reshape(1, d)
    bb2 = w_bias[d:].reshape(1, d)
    lnw2 = ln_w.reshape(1, d)
    lnb2 = ln_b.reshape(1, d)

    # ---- generator weight: select halves via block index maps (no copies)
    # when D is lane-aligned; tiny (test-only) D falls back to sliced halves so
    # the weight blocks equal the full array dims.
    if d % 128 == 0:
        w_gamma_arr, w_beta_arr, beta_col = w, w, 1
    else:
        w_gamma_arr, w_beta_arr, beta_col = w[:, :d], w[:, d:], 0

    vmem_limit = _vmem_limit_bytes(tm, d, dk, in_item, w_item, w_bufs, nk, usable)
    cost = pl.CostEstimate(
        flops=4 * n * d * d + 10 * n * d,
        transcendentals=n,                      # one rsqrt per row
        bytes_accessed=3 * n * d * in_item + (2 * d * d + 4 * d) * w_item)

    kernel_args = (a2, b2, w_gamma_arr, w_beta_arr, bg1, bb2, lnw2, lnb2)

    if nk == 1:
        def _const(shape, idx):
            # Grid-invariant operand: constant index map, and single-buffered
            # when the block is big enough for the VMEM saving to matter.
            if single_buf:
                return pl.BlockSpec(shape, lambda i, _idx=idx: _idx,
                                    pipeline_mode=pl.Buffered(buffer_count=1))
            return pl.BlockSpec(shape, lambda i, _idx=idx: _idx)

        out = pl.pallas_call(
            functools.partial(film_kernel, eps=eps),
            out_shape=jax.ShapeDtypeStruct((n, d), a_feat.dtype),
            grid_spec=pltpu.PrefetchScalarGridSpec(
                num_scalar_prefetch=0,
                grid=(grid_rows,),
                in_specs=[
                    pl.BlockSpec((tm, d), lambda i: (i, 0)),     # a rows
                    pl.BlockSpec((tm, d), lambda i: (i, 0)),     # b rows
                    _const((d, d), (0, 0)),                      # W gamma half
                    _const((d, d), (0, beta_col)),               # W beta half
                    _const((1, d), (0, 0)),                      # bias_gamma + 1
                    _const((1, d), (0, 0)),                      # bias_beta
                    _const((1, d), (0, 0)),                      # LN weight
                    _const((1, d), (0, 0)),                      # LN bias
                ],
                out_specs=pl.BlockSpec((tm, d), lambda i: (i, 0)),
            ),
            compiler_params=pltpu.CompilerParams(
                dimension_semantics=("parallel",),
                vmem_limit_bytes=vmem_limit),
            cost_estimate=cost,
        )(*kernel_args)
    else:
        out = pl.pallas_call(
            functools.partial(film_kernel_ksplit, eps=eps),
            out_shape=jax.ShapeDtypeStruct((n, d), a_feat.dtype),
            grid_spec=pltpu.PrefetchScalarGridSpec(
                num_scalar_prefetch=0,
                grid=(grid_rows, nk),
                in_specs=[
                    pl.BlockSpec((tm, d), lambda i, k: (i, 0)),   # a (revisited over k)
                    pl.BlockSpec((tm, dk), lambda i, k: (i, k)),  # b K-slab
                    pl.BlockSpec((dk, d), lambda i, k: (k, 0)),   # W gamma K-slab
                    pl.BlockSpec((dk, d), lambda i, k: (k, beta_col)),  # W beta K-slab
                    pl.BlockSpec((1, d), lambda i, k: (0, 0)),    # bias_gamma + 1
                    pl.BlockSpec((1, d), lambda i, k: (0, 0)),    # bias_beta
                    pl.BlockSpec((1, d), lambda i, k: (0, 0)),    # LN weight
                    pl.BlockSpec((1, d), lambda i, k: (0, 0)),    # LN bias
                ],
                out_specs=pl.BlockSpec((tm, d), lambda i, k: (i, 0)),
                scratch_shapes=[pltpu.VMEM((tm, d), jnp.float32),
                                pltpu.VMEM((tm, d), jnp.float32)],
            ),
            compiler_params=pltpu.CompilerParams(
                dimension_semantics=("parallel", "arbitrary"),
                vmem_limit_bytes=vmem_limit),
            cost_estimate=cost,
        )(*kernel_args)

    return out.reshape(orig_shape)


# --------------------------------------------------------------------------
# Reference + test
# --------------------------------------------------------------------------
def film_reference(a_feat, b_feat, w, w_bias, ln_w, ln_b, eps=1e-5):
    a = a_feat.astype(jnp.float32)
    b = b_feat.astype(jnp.float32)
    gb = jnp.einsum("...d,de->...e", b, w.astype(jnp.float32)) \
        + w_bias.astype(jnp.float32)
    d = a.shape[-1]
    gamma, beta = gb[..., :d], gb[..., d:]
    x = a + (a * gamma + beta)
    mean = jnp.mean(x, axis=-1, keepdims=True)
    var = jnp.mean((x - mean) ** 2, axis=-1, keepdims=True)
    return ((x - mean) * jax.lax.rsqrt(var + eps) * ln_w.astype(jnp.float32)
            + ln_b.astype(jnp.float32))


def _make_params(key, d_model, dtype):
    # torch Linear(d_model, 2*d_model) weight is (2D, D); we store its
    # transpose (D, 2D) for a row-major matmul.
    k_w, k_wb = jax.random.split(key)
    bound = 1.0 / (d_model ** 0.5)
    w = jax.random.uniform(k_w, (d_model, 2 * d_model), jnp.float32, -bound, bound)
    w_bias = jax.random.uniform(k_wb, (2 * d_model,), jnp.float32, -bound, bound)
    ln_w = jnp.ones((d_model,), jnp.float32)    # nn.LayerNorm default init
    ln_b = jnp.zeros((d_model,), jnp.float32)
    return (w.astype(dtype), w_bias.astype(dtype),
            ln_w.astype(dtype), ln_b.astype(dtype))


if __name__ == "__main__":
    key = jax.random.PRNGKey(0)
    keys = jax.random.split(key, 9)

    # Case 1: tiny f32 config (module's toy sizes); simple path, single step.
    batch, seq, d_model = 2, 8, 32
    a1 = jax.random.normal(keys[0], (batch, seq, d_model), dtype=jnp.float32)
    b1 = jax.random.normal(keys[1], (batch, seq, d_model), dtype=jnp.float32)
    w1, wb1, lw1, lb1 = _make_params(keys[2], d_model, jnp.float32)
    out1 = jax.block_until_ready(film_layer(a1, b1, w1, wb1, lw1, lb1))
    ref1 = film_reference(a1, b1, w1, wb1, lw1, lb1)
    assert out1.shape == (batch, seq, d_model)
    assert jnp.allclose(out1, ref1, atol=1e-5, rtol=1e-5), "case1: f32 mismatch"

    # Case 2: bf16, lane-dense D=128, ragged token count with a forced small
    # row tile -> exercises the no-pad ragged-edge path and bf16 MXU path.
    a2 = jax.random.normal(keys[3], (2, 24, 128), dtype=jnp.bfloat16)
    b2 = jax.random.normal(keys[4], (2, 24, 128), dtype=jnp.bfloat16)
    w2, wb2, lw2, lb2 = _make_params(keys[5], 128, jnp.bfloat16)
    out2 = jax.block_until_ready(
        film_layer(a2, b2, w2, wb2, lw2, lb2, row_tile=32))
    ref2 = film_reference(a2, b2, w2, wb2, lw2, lb2)
    assert out2.shape == (2, 24, 128)
    assert jnp.allclose(out2.astype(jnp.float32), ref2, atol=3e-2, rtol=3e-2), \
        "case2: bf16 mismatch"

    # Case 3: forced K-split (k_tile < D) to exercise the accumulator path
    # used for large-D / v7x configs.
    a3 = jax.random.normal(keys[6], (2, 32, 256), dtype=jnp.float32)
    b3 = jax.random.normal(keys[7], (2, 32, 256), dtype=jnp.float32)
    w3, wb3, lw3, lb3 = _make_params(keys[8], 256, jnp.float32)
    out3 = jax.block_until_ready(
        film_layer(a3, b3, w3, wb3, lw3, lb3, k_tile=128))
    ref3 = film_reference(a3, b3, w3, wb3, lw3, lb3)
    assert out3.shape == (2, 32, 256)
    assert jnp.allclose(out3, ref3, atol=1e-4, rtol=1e-4), "case3: k-split mismatch"

    print("KERNEL_OK")
</pallas_src>

<mosaic_0001>
module attributes {stable_mosaic.version = 11 : i64} {
  func.func @film_kernel(%arg0: i32, %arg1: memref<16x32xf32, #tpu.memory_space<vmem>>, %arg2: memref<16x32xf32, #tpu.memory_space<vmem>>, %arg3: memref<32x32xf32, #tpu.memory_space<vmem>>, %arg4: memref<32x32xf32, #tpu.memory_space<vmem>>, %arg5: memref<1x32xf32, #tpu.memory_space<vmem>>, %arg6: memref<1x32xf32, #tpu.memory_space<vmem>>, %arg7: memref<1x32xf32, #tpu.memory_space<vmem>>, %arg8: memref<1x32xf32, #tpu.memory_space<vmem>>, %arg9: memref<16x32xf32, #tpu.memory_space<vmem>>) attributes {dimension_semantics = [#tpu.dimension_semantics<parallel>], iteration_bounds = array<i64: 1>, scalar_prefetch = 0 : i64, scratch_operands = 0 : i64, tpu.core_type = #tpu.core_type<tc>, window_params = [{transform_indices = @transform_0, window_bounds = array<i64: 16, 32>}, {transform_indices = @transform_1, window_bounds = array<i64: 16, 32>}, {pipeline_mode = #tpu.pipeline_mode<synchronous>, transform_indices = @transform_2, window_bounds = array<i64: 32, 32>}, {pipeline_mode = #tpu.pipeline_mode<synchronous>, transform_indices = @transform_3, window_bounds = array<i64: 32, 32>}, {pipeline_mode = #tpu.pipeline_mode<synchronous>, transform_indices = @transform_4, window_bounds = array<i64: 1, 32>}, {pipeline_mode = #tpu.pipeline_mode<synchronous>, transform_indices = @transform_5, window_bounds = array<i64: 1, 32>}, {pipeline_mode = #tpu.pipeline_mode<synchronous>, transform_indices = @transform_6, window_bounds = array<i64: 1, 32>}, {pipeline_mode = #tpu.pipeline_mode<synchronous>, transform_indices = @transform_7, window_bounds = array<i64: 1, 32>}, {transform_indices = @transform_8, window_bounds = array<i64: 16, 32>}]} {
    %c0 = arith.constant 0 : index
    %c0_0 = arith.constant 0 : index
    %0 = vector.load %arg2[%c0, %c0_0] : memref<16x32xf32, #tpu.memory_space<vmem>>, vector<16x32xf32>
    %c0_1 = arith.constant 0 : index
    %c0_2 = arith.constant 0 : index
    %1 = vector.load %arg3[%c0_1, %c0_2] : memref<32x32xf32, #tpu.memory_space<vmem>>, vector<32x32xf32>
    %cst = arith.constant dense<0.000000e+00> : vector<16x32xf32>
    %2 = tpu.matmul %0, %1, %cst {dimension_numbers = #tpu.dot_dimension_numbers<[1], [0], [0], [1], [0, 0, 1, 1], [], []>} : vector<16x32xf32>, vector<32x32xf32>, vector<16x32xf32> -> vector<16x32xf32>
    %c0_3 = arith.constant 0 : index
    %c0_4 = arith.constant 0 : index
    %3 = vector.load %arg4[%c0_3, %c0_4] : memref<32x32xf32, #tpu.memory_space<vmem>>, vector<32x32xf32>
    %cst_5 = arith.constant dense<0.000000e+00> : vector<16x32xf32>
    %4 = tpu.matmul %0, %3, %cst_5 {dimension_numbers = #tpu.dot_dimension_numbers<[1], [0], [0], [1], [0, 0, 1, 1], [], []>} : vector<16x32xf32>, vector<32x32xf32>, vector<16x32xf32> -> vector<16x32xf32>
    %c0_6 = arith.constant 0 : index
    %c0_7 = arith.constant 0 : index
    %5 = vector.load %arg5[%c0_6, %c0_7] : memref<1x32xf32, #tpu.memory_space<vmem>>, vector<1x32xf32>
    %6 = vector.broadcast %5 : vector<1x32xf32> to vector<16x32xf32>
    %7 = arith.addf %2, %6 : vector<16x32xf32>
    %c0_8 = arith.constant 0 : index
    %c0_9 = arith.constant 0 : index
    %8 = vector.load %arg6[%c0_8, %c0_9] : memref<1x32xf32, #tpu.memory_space<vmem>>, vector<1x32xf32>
    %9 = vector.broadcast %8 : vector<1x32xf32> to vector<16x32xf32>
    %10 = arith.addf %4, %9 : vector<16x32xf32>
    %c0_10 = arith.constant 0 : index
    %c0_11 = arith.constant 0 : index
    %11 = vector.load %arg1[%c0_10, %c0_11] : memref<16x32xf32, #tpu.memory_space<vmem>>, vector<16x32xf32>
    %c0_12 = arith.constant 0 : index
    %c0_13 = arith.constant 0 : index
    %12 = vector.load %arg7[%c0_12, %c0_13] : memref<1x32xf32, #tpu.memory_space<vmem>>, vector<1x32xf32>
    %c0_14 = arith.constant 0 : index
    %c0_15 = arith.constant 0 : index
    %13 = vector.load %arg8[%c0_14, %c0_15] : memref<1x32xf32, #tpu.memory_space<vmem>>, vector<1x32xf32>
    %14 = arith.mulf %11, %7 : vector<16x32xf32>
    %15 = arith.addf %14, %10 : vector<16x32xf32>
    %cst_16 = arith.constant dense<0.000000e+00> : vector<16xf32>
    %16 = vector.multi_reduction <add>, %15, %cst_16 [1] : vector<16x32xf32> to vector<16xf32>
    %17 = vector.shape_cast %16 : vector<16xf32> to vector<16x1xf32>
    %cst_17 = arith.constant 3.200000e+01 : f32
    %18 = vector.broadcast %cst_17 : f32 to vector<16x1xf32>
    %19 = arith.divf %17, %18 : vector<16x1xf32>
    %20 = vector.broadcast %19 : vector<16x1xf32> to vector<16x32xf32>
    %21 = arith.subf %15, %20 : vector<16x32xf32>
    %22 = arith.mulf %21, %21 : vector<16x32xf32>
    %cst_18 = arith.constant dense<0.000000e+00> : vector<16xf32>
    %23 = vector.multi_reduction <add>, %22, %cst_18 [1] : vector<16x32xf32> to vector<16xf32>
    %24 = vector.shape_cast %23 : vector<16xf32> to vector<16x1xf32>
    %cst_19 = arith.constant 3.200000e+01 : f32
    %25 = vector.broadcast %cst_19 : f32 to vector<16x1xf32>
    %26 = arith.divf %24, %25 : vector<16x1xf32>
    %cst_20 = arith.constant 9.99999974E-6 : f32
    %27 = vector.broadcast %cst_20 : f32 to vector<16x1xf32>
    %28 = arith.addf %26, %27 : vector<16x1xf32>
    %29 = math.rsqrt %28 : vector<16x1xf32>
    %30 = vector.broadcast %29 : vector<16x1xf32> to vector<16x32xf32>
    %31 = arith.mulf %21, %30 : vector<16x32xf32>
    %32 = vector.broadcast %12 : vector<1x32xf32> to vector<16x32xf32>
    %33 = arith.mulf %31, %32 : vector<16x32xf32>
    %34 = vector.broadcast %13 : vector<1x32xf32> to vector<16x32xf32>
    %35 = arith.addf %33, %34 : vector<16x32xf32>
    %c0_21 = arith.constant 0 : index
    %c0_22 = arith.constant 0 : index
    %36 = vector.load %arg9[%c0_21, %c0_22] : memref<16x32xf32, #tpu.memory_space<vmem>>, vector<16x32xf32>
    tpu.vector_store %arg9[%c0_21, %c0_22], %35 {strides = array<i32>} : memref<16x32xf32, #tpu.memory_space<vmem>>, vector<16x32xf32>,
    return
  }
  func.func @transform_0(%arg0: i32) -> (i32, i32) {
    %c0_i32 = arith.constant 0 : i32
    %c0_i32_0 = arith.constant 0 : i32
    return %arg0, %c0_i32 : i32, i32
  }
  func.func @transform_1(%arg0: i32) -> (i32, i32) {
    %c0_i32 = arith.constant 0 : i32
    %c0_i32_0 = arith.constant 0 : i32
    return %arg0, %c0_i32 : i32, i32
  }
  func.func @transform_2(%arg0: i32) -> (i32, i32) {
    %c0_i32 = arith.constant 0 : i32
    %c0_i32_0 = arith.constant 0 : i32
    %c0_i32_1 = arith.constant 0 : i32
    return %c0_i32, %c0_i32_0 : i32, i32
  }
  func.func @transform_3(%arg0: i32) -> (i32, i32) {
    %c0_i32 = arith.constant 0 : i32
    %c0_i32_0 = arith.constant 0 : i32
    %c0_i32_1 = arith.constant 0 : i32
    return %c0_i32, %c0_i32_0 : i32, i32
  }
  func.func @transform_4(%arg0: i32) -> (i32, i32) {
    %c0_i32 = arith.constant 0 : i32
    %c0_i32_0 = arith.constant 0 : i32
    %c0_i32_1 = arith.constant 0 : i32
    return %c0_i32, %c0_i32_0 : i32, i32
  }
  func.func @transform_5(%arg0: i32) -> (i32, i32) {
    %c0_i32 = arith.constant 0 : i32
    %c0_i32_0 = arith.constant 0 : i32
    %c0_i32_1 = arith.constant 0 : i32
    return %c0_i32, %c0_i32_0 : i32, i32
  }
  func.func @transform_6(%arg0: i32) -> (i32, i32) {
    %c0_i32 = arith.constant 0 : i32
    %c0_i32_0 = arith.constant 0 : i32
    %c0_i32_1 = arith.constant 0 : i32
    return %c0_i32, %c0_i32_0 : i32, i32
  }
  func.func @transform_7(%arg0: i32) -> (i32, i32) {
    %c0_i32 = arith.constant 0 : i32
    %c0_i32_0 = arith.constant 0 : i32
    %c0_i32_1 = arith.constant 0 : i32
    return %c0_i32, %c0_i32_0 : i32, i32
  }
  func.func @transform_8(%arg0: i32) -> (i32, i32) {
    %c0_i32 = arith.constant 0 : i32
    %c0_i32_0 = arith.constant 0 : i32
    return %arg0, %c0_i32 : i32, i32
  }
}

</mosaic_0001>

<bundles_post_ra>
// kernel: tpu_custom_call.1
= control target key start
LH: loop header
LB: loop body
LE: loop exit
PB: predicated region body
PF: predicated region fallthrough
CT: control target
= control target key end

     0   :  { %13 = vsyncpa [#allocation3], 0  ;;  %s688_s0 = inlined_call_operand.hbm [shape: f32[16,32], index: 0, kind: input, shape index: {}]   ;;  %s689_s1 = inlined_call_operand.hbm [shape: f32[16,32], index: 1, kind: input, shape index: {}]   ;;  %s690_s2 = inlined_call_operand.hbm [shape: f32[32,32], index: 2, kind: input, shape index: {}]   ;;  %s691_s3 = inlined_call_operand.hbm [shape: f32[32,32], index: 3, kind: input, shape index: {}]   ;;  %s692_s4 = inlined_call_operand.vmem [shape: f32[1,32], index: 4, kind: input, shape index: {}]   ;;  %s693_s5 = inlined_call_operand.vmem [shape: f32[1,32], index: 5, kind: input, shape index: {}]   ;;  %s694_s6 = inlined_call_operand.vmem [shape: f32[1,32], index: 6, kind: input, shape index: {}]   ;;  %s695_s7 = inlined_call_operand.vmem [shape: f32[1,32], index: 7, kind: input, shape index: {}]   ;;  %s696_s8 = inlined_call_operand.hbm [shape: f32[16,32], index: 8, kind: output, shape index: {}]  }
   0x1   :  { %14 = vsyncpa [#allocation6], 0 }
   0x2   :  { %15 = vsyncpa [#allocation9], 0 }
   0x3   :  { %16 = vsyncpa [#allocation4], 0  ;;  %s525_s27 = smov [#allocation5]   ;;  %s526_s29 = smov [#allocation2]  }
   0x4   :  { %s34_s28 = sshll.u32 %s525_s27, 4  ;;  %s22_s30 = sshll.u32 %s526_s29, 4  ;;  %s35_s28 = int_to_ptr.vmem [resolvable:$true] %s34_s28  ;;  %s577_s30 = int_to_ptr.vmem [resolvable:$true] %s22_s30 }
   0x5   :  { %s407_s11 = scalar_lea.hbm %s689_s1, 256 }
   0x6   :  { %p408_p0 = scmp.ne.s32.totalorder %s689_s1, %s407_s11  ;;  %p411_p1 = scmp.lt.u32.totalorder %s407_s11, %s689_s1 }
   0x8   :  { %p413_p2 = pnand %p411_p1, %p408_p0 }
   0xa   :  { %416 = shalt.err (!%p413_p2)
}
   0xb   :  { %s417_s16 = scalar_lea.vmem %s35_s28, 256  ;;  %p422_p4 = scmp.lt.s32.totalorder %s35_s28, %s35_s28 }
   0xc   :  { %p418_p3 = scmp.ne.s32.totalorder %s35_s28, %s417_s16  ;;  %p423_p5 = scmp.lt.s32.totalorder %s417_s16, %s417_s16 }
   0xe   :  { %p424_p6 = por %p423_p5, %p422_p4 }
  0x10   :  { %p425_p7 = pnand %p424_p6, %p418_p3 }
  0x12   :  { %428 = shalt.err (!%p425_p7)
}
  0x13   :  { %s527_s17 = smov 128   ;;  %s528_s18 = smov 8  }
  0x14   :  { %40 = dma.hbm_to_vmem [thread:$0]  %s689_s1, 256, %s35_s28, [#allocation6], %s527_s17, %s527_s17, %s528_s18  }
  0x15   :  { %s429_s23 = scalar_lea.hbm %s688_s0, 256 }
  0x16   :  { %p430_p8 = scmp.ne.s32.totalorder %s688_s0, %s429_s23  ;;  %p433_p9 = scmp.lt.u32.totalorder %s429_s23, %s688_s0 }
  0x18   :  { %p435_p10 = pnand %p433_p9, %p430_p8 }
  0x1a   :  { %438 = shalt.err (!%p435_p10)
}
  0x1b   :  { %s439_s29 = scalar_lea.vmem %s577_s30, 256  ;;  %p444_p12 = scmp.lt.s32.totalorder %s577_s30, %s577_s30 }
  0x1c   :  { %p440_p11 = scmp.ne.s32.totalorder %s577_s30, %s439_s29  ;;  %p445_p13 = scmp.lt.s32.totalorder %s439_s29, %s439_s29 }
  0x1e   :  { %p446_p0 = por %p445_p13, %p444_p12 }
  0x20   :  { %p447_p1 = pnand %p446_p0, %p440_p11 }
  0x22   :  { %450 = shalt.err (!%p447_p1)
}
  0x23   :  { %28 = dma.hbm_to_vmem [thread:$0]  %s688_s0, 256, %s577_s30, [#allocation3], %s527_s17, %s527_s17, %s528_s18  }
  0x24   :  { %s529_s9 = smov [#allocation7]   ;;  %s530_s11 = smov [#allocation8]  }
  0x25   :  { %s46_s10 = sshll.u32 %s529_s9, 4  ;;  %s58_s12 = sshll.u32 %s530_s11, 4  ;;  %s47_s10 = int_to_ptr.vmem [resolvable:$true] %s46_s10  ;;  %s614_s12 = int_to_ptr.vmem [resolvable:$true] %s58_s12 }
  0x26   :  { %s451_s15 = scalar_lea.hbm %s690_s2, 512 }
  0x27   :  { %p452_p2 = scmp.ne.s32.totalorder %s690_s2, %s451_s15  ;;  %p455_p3 = scmp.lt.u32.totalorder %s451_s15, %s690_s2 }
  0x29   :  { %p457_p4 = pnand %p455_p3, %p452_p2 }
  0x2b   :  { %460 = shalt.err (!%p457_p4)
}
  0x2c   :  { %s461_s0 = scalar_lea.vmem %s47_s10, 512  ;;  %p466_p6 = scmp.lt.s32.totalorder %s47_s10, %s47_s10 }
  0x2d   :  { %p462_p5 = scmp.ne.s32.totalorder %s47_s10, %s461_s0  ;;  %p467_p7 = scmp.lt.s32.totalorder %s461_s0, %s461_s0 }
  0x2f   :  { %p468_p8 = por %p467_p7, %p466_p6 }
  0x31   :  { %p469_p9 = pnand %p468_p8, %p462_p5 }
  0x33   :  { %472 = shalt.err (!%p469_p9)
}
  0x34   :  { %52 = dma.hbm_to_vmem [thread:$0]  %s690_s2, 512, %s47_s10, [#allocation6], %s527_s17, %s527_s17, %s528_s18  }
  0x35   :  { %s473_s25 = scalar_lea.hbm %s691_s3, 512 }
  0x36   :  { %p474_p10 = scmp.ne.s32.totalorder %s691_s3, %s473_s25  ;;  %p477_p11 = scmp.lt.u32.totalorder %s473_s25, %s691_s3 }
  0x38   :  { %p479_p12 = pnand %p477_p11, %p474_p10 }
  0x3a   :  { %482 = shalt.err (!%p479_p12)
}
  0x3b   :  { %s483_s28 = scalar_lea.vmem %s614_s12, 512  ;;  %p488_p0 = scmp.lt.s32.totalorder %s614_s12, %s614_s12 }
  0x3c   :  { %p484_p13 = scmp.ne.s32.totalorder %s614_s12, %s483_s28  ;;  %p489_p1 = scmp.lt.s32.totalorder %s483_s28, %s483_s28 }
  0x3e   :  { %p490_p2 = por %p489_p1, %p488_p0 }
  0x40   :  { %p491_p3 = pnand %p490_p2, %p484_p13 }
  0x42   :  { %494 = shalt.err (!%p491_p3)
}
  0x43   :  { %64 = dma.hbm_to_vmem [thread:$0]  %s691_s3, 512, %s614_s12, [#allocation9], %s527_s17, %s527_s17, %s528_s18  }
  0x44   :  { %517 = dma.done.wait [#allocation3], 256  }
  0x45   :  { %518 = vsyncadd [#allocation3], 4294967040 }
  0x46   :  { %519 = dma.done.wait [#allocation6], 768  }
  0x47   :  { %520 = vsyncadd [#allocation6], 4294966528 }
  0x48   :  { %521 = dma.done.wait [#allocation9], 512  }
  0x49   :  { %522 = vsyncadd [#allocation9], 4294966784  ;;  %v87_v0 = vld [vmem:[#allocation7] sm:$0xff]  ;;  %v88_v1 = vld [vmem:[#allocation7 + $0x8] sm:$0xff]  ;;  %vm102_vm0 = vcmask 261120   ;;  %s531_s15 = smov [#allocation10]  }
  0x4a   :  { %v91_v2 = vld [vmem:[#allocation8] sm:$0xff]  ;;  %v380_v3 = vpack.c.bf16 %v88_v1, %v87_v0  ;;  %v92_v4 = vld [vmem:[#allocation8 + $0x8] sm:$0xff]  ;;  %v89_v5 = vld [vmem:[#allocation7 + $0x10] sm:$0xff]  ;;  %s324_s16 = sshll.u32 %s531_s15, 4  ;;  %s325_s16 = int_to_ptr.vmem [resolvable:$true] %s324_s16 }
  0x4b   :  { %v90_v6 = vld [vmem:[#allocation7 + $0x18] sm:$0xff]  ;;  %v388_v7 = vpack.c.bf16 %v92_v4, %v91_v2  ;;  %v93_v9 = vld [vmem:[#allocation8 + $0x10] sm:$0xff]  ;;  %v338_v14 = vld [vmem:[%s692_s4] ss:$0 sm:$0xff]  ;;  %s495_s19 = scalar_lea.vmem %s325_s16, 256  ;;  %p500_p5 = scmp.lt.s32.totalorder %s325_s16, %s325_s16 }
  0x4c   :  { %v384_v8 = vpack.c.bf16 %v90_v6, %v89_v5  ;;  %v94_v10 = vld [vmem:[#allocation8 + $0x18] sm:$0xff]  ;;  %v85_v11 = vld [vmem:[#allocation5] sm:$0xff]  ;;  %381 = vmatprep.subr.bf16.mxu0 %v380_v3  ;;  %v341_v15 = vld [vmem:[%s693_s5] ss:$0 sm:$0xff]  ;;  %p496_p4 = scmp.ne.s32.totalorder %s325_s16, %s495_s19  ;;  %p501_p6 = scmp.lt.s32.totalorder %s495_s19, %s495_s19 }
  0x4d   :  { %v392_v12 = vpack.c.bf16 %v94_v10, %v93_v9  ;;  %366 = vmatprep.mubr.msk.f32.mxu0 %vm102_vm0, %v85_v11  ;;  %383 = vmatpush3.bf16.msra.mxu0 %v380_v3  ;;  %v86_v13 = vld [vmem:[#allocation5 + $0x8] sm:$0xff]  ;;  %v267_v17 = vld [vmem:[#allocation2 + $0x8] sm:$0xff]  ;;  %v266_v20 = vld [vmem:[#allocation2] sm:$0xff] }
  0x4e   :  { %389 = vmatprep.subr.bf16.mxu1 %v388_v7  ;;  %385 = vmatprep.subr.bf16.mxu0 %v384_v8  ;;  %v344_v49 = vld [vmem:[%s694_s6] ss:$0 sm:$0xff]  ;;  %p502_p7 = por %p501_p6, %p500_p5 }
  0x4f   :  { %391 = vmatpush3.bf16.msra.mxu1 %v388_v7  ;;  %377 = vmatprep.mubr.msk.f32.mxu1 %vm102_vm0, %v85_v11  ;;  %v345_v51 = vld [vmem:[%s695_s7] ss:$0 sm:$0xff] }
  0x50   :  { %393 = vmatprep.subr.bf16.mxu1 %v392_v12  ;;  %p503_p8 = pnand %p502_p7, %p496_p4 }
  0x51   :  { %387 = vmatpush3.bf16.msra.mxu0 %v384_v8 }
  0x53   :  { %395 = vmatpush3.bf16.msra.mxu1 %v392_v12 }
  0x54   :  { %367 = vmatmul.mubr.msk.f32.vlgmr.msra.gmra.mrb[0].mxu0 %vm102_vm0, %v86_v13 }
  0x56   :  { %378 = vmatmul.mubr.msk.f32.vlgmr.msra.gmra.mrb[0].mxu1 %vm102_vm0, %v86_v13 }
 0x127   :  { %v368_v16 = vpop.f32.mrb[0].mxu0 }
 0x128   :  { %v181_v18 = vadd.f32 %v368_v16, %v338_v14  ;;  %v175_v19 = vpop.f32.mrb[1].mxu0 }
 0x129   :  { %v379_v21 = vpop.f32.mrb[0].mxu1  ;;  %v176_v22 = vadd.f32 %v338_v14, %v175_v19 }
 0x12a   :  { %v263_v23 = vadd.f32 %v379_v21, %v341_v15  ;;  %v257_v24 = vpop.f32.mrb[1].mxu1  ;;  %v271_v25 = vmul.f32 %v267_v17, %v181_v18 }
 0x12b   :  { %v258_v26 = vadd.f32 %v341_v15, %v257_v24  ;;  %v270_v27 = vmul.f32 %v266_v20, %v176_v22 }
 0x12c   :  { %v273_v28 = vadd.f32 %v271_v25, %v263_v23 }
 0x12d   :  { %v272_v29 = vadd.f32 %v270_v27, %v258_v26 }
 0x12e   :  { %v277_v31 = vsel %vm102_vm0, %v273_v28, 0.0 }
 0x12f   :  { %v274_v30 = vsel %vm102_vm0, %v272_v29, 0.0 }
 0x130   :  { %275 = vadd.xlane.f32.xlu0 %v274_v30 }
 0x134   :  { %278 = vadd.xlane.f32.xlu0 %v277_v31 }
 0x1bd   :  { %v276_v32 = vpop.xlane.xlu0 %275 }
 0x1be   :  { %v281_v33 = vmul.f32 0.03125, %v276_v32 }
 0x1c0   :  { %v283_v34 = vsub.f32 %v272_v29, %v281_v33 }
 0x1c1   :  { %v279_v35 = vpop.xlane.xlu0 %278 }
 0x1c2   :  { %v282_v36 = vmul.f32 0.03125, %v279_v35  ;;  %v285_v37 = vmul.f32 %v283_v34, %v283_v34 }
 0x1c4   :  { %v284_v38 = vsub.f32 %v273_v28, %v282_v36  ;;  %v287_v39 = vsel %vm102_vm0, %v285_v37, 0.0 }
 0x1c5   :  { %288 = vadd.xlane.f32.xlu1 %v287_v39 }
 0x1c6   :  { %v286_v40 = vmul.f32 %v284_v38, %v284_v38 }
 0x1c8   :  { %v290_v41 = vsel %vm102_vm0, %v286_v40, 0.0 }
 0x1c9   :  { %291 = vadd.xlane.f32.xlu1 %v290_v41 }
 0x252   :  { %v289_v42 = vpop.xlane.xlu1 %288 }
 0x253   :  { %v293_v43 = vmul.f32 0.03125, %v289_v42 }
 0x255   :  { %v295_v44 = vadd.f32 1e-05, %v293_v43 }
 0x256   :  { %v292_v45 = vpop.xlane.xlu1 %291 }
 0x257   :  { %403 = vrsqrt.f32 %v295_v44  ;;  %v294_v46 = vmul.f32 0.03125, %v292_v45 }
 0x259   :  { %v296_v47 = vadd.f32 1e-05, %v294_v46 }
 0x25b   :  { %405 = vrsqrt.f32 %v296_v47 }
 0x261   :  { %v404_v48 = vpop.eup %403 }
 0x262   :  { %v299_v50 = vmul.f32 %v404_v48, %v283_v34 }
 0x264   :  { %v307_v52 = vmul.f32 %v344_v49, %v299_v50 }
 0x265   :  { %v406_v53 = vpop.eup %405 }
 0x266   :  { %v300_v54 = vmul.f32 %v406_v53, %v284_v38  ;;  %v315_v55 = vadd.f32 %v345_v51, %v307_v52 }
 0x268   :  { %v308_v56 = vmul.f32 %v344_v49, %v300_v54  ;;  %317 = vst.msk [vmem:[#allocation10] sm:$0xff] %vm102_vm0, %v315_v55 }
 0x26a   :  { %v316_v57 = vadd.f32 %v345_v51, %v308_v56 }
 0x26c   :  { %318 = vst.msk [vmem:[#allocation10 + $0x8] sm:$0xff] %vm102_vm0, %v316_v57 }
 0x26d   :  { %506 = shalt.err (!%p503_p8)
}
 0x26e   :  { %s507_s20 = scalar_lea.hbm %s696_s8, 256 }
 0x26f   :  { %p508_p9 = scmp.ne.s32.totalorder %s696_s8, %s507_s20  ;;  %p511_p10 = scmp.lt.u32.totalorder %s507_s20, %s696_s8 }
 0x271   :  { %p513_p11 = pnand %p511_p10, %p508_p9 }
 0x273   :  { %516 = shalt.err (!%p513_p11)
}
 0x274   :  { %330 = dma.vmem_to_hbm [thread:$0]  %s325_s16, 256, %s696_s8, [#allocation4], %s527_s17, %s527_s17, %s528_s18  }
 0x275   :  { %523 = dma.done.wait [#allocation4], 256  }
 0x276   :  { %524 = vsyncadd [#allocation4], 4294967040 }
 0x277   :  { %334 = vsyncpa [#allocation3], 1 }
 0x278   :  { %335 = vsyncpa [#allocation6], 1 }
 0x279   :  { %336 = vsyncpa [#allocation9], 1 }
 0x27a   :  { %337 = vsyncpa [#allocation4], 1 }

</bundles_post_ra>
